<compile_context>
chip_gen: v7x
topology: tpu7x:2x2x1
jax: 0.10.0
libtpu: 0.0.40
codegen_flags: <defaults>
</compile_context>

<pallas_src>
import jax
import jax.numpy as jnp
from jax.experimental import pallas as pl
from jax.experimental.pallas import tpu as pltpu

H_PAD = 128   # hidden width 16 padded to full lane width
O_PAD = 128   # output 10 padded to full lane width (lane-dense stores)


def _round_up(n, m):
    return ((n + m - 1) // m) * m


def mlp2_kernel(x_ref, w1_ref, b1_ref, w23_ref, b23_ref, o_ref):
    # fc1 + ReLU: MXU matmul with f32 accumulation; bias/ReLU on the f32 acc.
    h = jnp.dot(x_ref[...], w1_ref[...], preferred_element_type=jnp.float32)
    h = jnp.maximum(h + b1_ref[...], 0.0)
    # fc2+fc3 fused into one matmul (mathematically exact: no activation between).
    y = jnp.dot(h.astype(w23_ref.dtype), w23_ref[...],
                preferred_element_type=jnp.float32) + b23_ref[...]
    o_ref[...] = y.astype(o_ref.dtype)


def mlp2_forward(x, w1, b1, w2, b2, w3, b3, *,
                 block_b=1024, param_dtype=jnp.bfloat16,
                 out_dtype=jnp.float32, min_grid_steps=8):
    """y = relu(x @ W1 + b1) @ (W2 @ W3) + (b2 @ W3 + b3).

    x: (B, 784); weights stored as (in, out); biases as (1, out).
    """
    B, K = x.shape
    H1 = w1.shape[1]
    out_dim = w3.shape[1]

    # --- Algebraic fusion of fc2 and fc3 (done once, outside the kernel). ---
    w23 = (w2 @ w3).astype(param_dtype)            # (16, 10)
    b23 = (b2 @ w3 + b3).astype(jnp.float32)       # (1, 10)

    # --- Batch tile: <= block_b, multiple of 8, and small enough that big
    #     batches get >= min_grid_steps grid steps (v7x megacore).  No
    #     padding of B: pl.cdiv handles the partial edge block. ---
    tb = min(block_b,
             _round_up(B, 8),
             max(512, _round_up(pl.cdiv(B, min_grid_steps), 8)))
    grid = (pl.cdiv(B, tb),)

    # --- x stays unpadded (no HBM copy); only the tiny VMEM-resident
    #     weights/biases are zero-padded to lane width.  Exact: padded hidden
    #     units see zero weight + zero bias -> relu(0)=0, and their rows of
    #     W23 are zero. ---
    xk = x.astype(param_dtype)                     # no-op if caller passes bf16
    w1p = jnp.zeros((K, H_PAD), param_dtype).at[:, :H1].set(w1.astype(param_dtype))
    b1p = jnp.zeros((1, H_PAD), jnp.float32).at[:, :H1].set(b1.astype(jnp.float32))
    w23p = jnp.zeros((H_PAD, O_PAD), param_dtype).at[:H1, :out_dim].set(w23)
    b23p = jnp.zeros((1, O_PAD), jnp.float32).at[:, :out_dim].set(b23)

    out = pl.pallas_call(
        mlp2_kernel,
        out_shape=jax.ShapeDtypeStruct((B, O_PAD), out_dtype),
        grid=grid,
        in_specs=[
            pl.BlockSpec((tb, K), lambda i: (i, 0)),          # x: batch-tiled, unpadded
            pl.BlockSpec((K, H_PAD), lambda i: (0, 0)),       # W1 (VMEM-resident)
            pl.BlockSpec((1, H_PAD), lambda i: (0, 0)),       # b1
            pl.BlockSpec((H_PAD, O_PAD), lambda i: (0, 0)),   # fused W23
            pl.BlockSpec((1, O_PAD), lambda i: (0, 0)),       # fused b23
        ],
        out_specs=pl.BlockSpec((tb, O_PAD), lambda i: (i, 0)),
        compiler_params=pltpu.CompilerParams(
            dimension_semantics=("parallel",)),
    )(xk, w1p, b1p, w23p, b23p)

    # Only the first out_dim of the 128 lanes are real logits.  Consumers that
    # can read the padded (B, 128) buffer directly should skip this slice copy.
    return out[:, :out_dim]


def init_linear(key, fan_in, fan_out):
    # Deterministic init mimicking nn.Linear default (uniform +/- 1/sqrt(fan_in)).
    kw, kb = jax.random.split(key)
    bound = 1.0 / jnp.sqrt(jnp.float32(fan_in))
    # Stored as (in, out) so the kernel computes x @ W (== x @ W_pt.T).
    w = jax.random.uniform(kw, (fan_in, fan_out), jnp.float32, -bound, bound)
    b = jax.random.uniform(kb, (1, fan_out), jnp.float32, -bound, bound)
    return w, b


if __name__ == "__main__":
    key = jax.random.PRNGKey(0)
    kx, k1, k2, k3 = jax.random.split(key, 4)

    B = 8
    x = jax.random.normal(kx, (B, 784), jnp.float32)

    w1, b1 = init_linear(k1, 784, 16)
    w2, b2 = init_linear(k2, 16, 64)
    w3, b3 = init_linear(k3, 64, 10)

    # Pure-JAX reference of the same forward pass (unfused, f32).
    ref = jnp.maximum(x @ w1 + b1, 0.0)
    ref = ref @ w2 + b2
    ref = ref @ w3 + b3

    # Exactness check on the f32 path.
    fwd_f32 = jax.jit(lambda *a: mlp2_forward(*a, param_dtype=jnp.float32))
    out_f32 = jax.block_until_ready(fwd_f32(x, w1, b1, w2, b2, w3, b3))
    assert out_f32.shape == (B, 10)
    assert jnp.allclose(out_f32, ref, atol=1e-4, rtol=1e-4)

    # Default (bf16 params, f32 accumulation/output) path: looser tolerance.
    fwd_bf16 = jax.jit(mlp2_forward)
    out_bf16 = jax.block_until_ready(fwd_bf16(x, w1, b1, w2, b2, w3, b3))
    assert out_bf16.shape == (B, 10)
    assert jnp.allclose(out_bf16, ref, atol=5e-2, rtol=5e-2)

    print("KERNEL_OK")
</pallas_src>

<mosaic_0001>
module attributes {stable_mosaic.version = 11 : i64} {
  func.func @mlp2_kernel(%arg0: i32, %arg1: memref<8x784xf32, #tpu.memory_space<vmem>>, %arg2: memref<784x128xf32, #tpu.memory_space<vmem>>, %arg3: memref<1x128xf32, #tpu.memory_space<vmem>>, %arg4: memref<128x128xf32, #tpu.memory_space<vmem>>, %arg5: memref<1x128xf32, #tpu.memory_space<vmem>>, %arg6: memref<8x128xf32, #tpu.memory_space<vmem>>) attributes {dimension_semantics = [#tpu.dimension_semantics<parallel>], iteration_bounds = array<i64: 1>, scalar_prefetch = 0 : i64, scratch_operands = 0 : i64, tpu.core_type = #tpu.core_type<tc>, window_params = [{transform_indices = @transform_0, window_bounds = array<i64: 8, 784>}, {pipeline_mode = #tpu.pipeline_mode<synchronous>, transform_indices = @transform_1, window_bounds = array<i64: 784, 128>}, {pipeline_mode = #tpu.pipeline_mode<synchronous>, transform_indices = @transform_2, window_bounds = array<i64: 1, 128>}, {pipeline_mode = #tpu.pipeline_mode<synchronous>, transform_indices = @transform_3, window_bounds = array<i64: 128, 128>}, {pipeline_mode = #tpu.pipeline_mode<synchronous>, transform_indices = @transform_4, window_bounds = array<i64: 1, 128>}, {transform_indices = @transform_5, window_bounds = array<i64: 8, 128>}]} {
    %c0 = arith.constant 0 : index
    %c0_0 = arith.constant 0 : index
    %0 = vector.load %arg1[%c0, %c0_0] : memref<8x784xf32, #tpu.memory_space<vmem>>, vector<8x784xf32>
    %c0_1 = arith.constant 0 : index
    %c0_2 = arith.constant 0 : index
    %1 = vector.load %arg2[%c0_1, %c0_2] : memref<784x128xf32, #tpu.memory_space<vmem>>, vector<784x128xf32>
    %cst = arith.constant dense<0.000000e+00> : vector<8x128xf32>
    %2 = tpu.matmul %0, %1, %cst {dimension_numbers = #tpu.dot_dimension_numbers<[1], [0], [0], [1], [0, 0, 1, 1], [], []>} : vector<8x784xf32>, vector<784x128xf32>, vector<8x128xf32> -> vector<8x128xf32>
    %c0_3 = arith.constant 0 : index
    %c0_4 = arith.constant 0 : index
    %3 = vector.load %arg3[%c0_3, %c0_4] : memref<1x128xf32, #tpu.memory_space<vmem>>, vector<1x128xf32>
    %4 = vector.broadcast %3 : vector<1x128xf32> to vector<8x128xf32>
    %5 = arith.addf %2, %4 : vector<8x128xf32>
    %cst_5 = arith.constant 0.000000e+00 : f32
    %6 = vector.broadcast %cst_5 : f32 to vector<8x128xf32>
    %7 = arith.maximumf %5, %6 : vector<8x128xf32>
    %c0_6 = arith.constant 0 : index
    %c0_7 = arith.constant 0 : index
    %8 = vector.load %arg4[%c0_6, %c0_7] : memref<128x128xf32, #tpu.memory_space<vmem>>, vector<128x128xf32>
    %cst_8 = arith.constant dense<0.000000e+00> : vector<8x128xf32>
    %9 = tpu.matmul %7, %8, %cst_8 {dimension_numbers = #tpu.dot_dimension_numbers<[1], [0], [0], [1], [0, 0, 1, 1], [], []>} : vector<8x128xf32>, vector<128x128xf32>, vector<8x128xf32> -> vector<8x128xf32>
    %c0_9 = arith.constant 0 : index
    %c0_10 = arith.constant 0 : index
    %10 = vector.load %arg5[%c0_9, %c0_10] : memref<1x128xf32, #tpu.memory_space<vmem>>, vector<1x128xf32>
    %11 = vector.broadcast %10 : vector<1x128xf32> to vector<8x128xf32>
    %12 = arith.addf %9, %11 : vector<8x128xf32>
    %c0_11 = arith.constant 0 : index
    %c0_12 = arith.constant 0 : index
    %13 = vector.load %arg6[%c0_11, %c0_12] : memref<8x128xf32, #tpu.memory_space<vmem>>, vector<8x128xf32>
    tpu.vector_store %arg6[%c0_11, %c0_12], %12 {strides = array<i32>} : memref<8x128xf32, #tpu.memory_space<vmem>>, vector<8x128xf32>,
    return
  }
  func.func @transform_0(%arg0: i32) -> (i32, i32) {
    %c0_i32 = arith.constant 0 : i32
    %c0_i32_0 = arith.constant 0 : i32
    return %arg0, %c0_i32 : i32, i32
  }
  func.func @transform_1(%arg0: i32) -> (i32, i32) {
    %c0_i32 = arith.constant 0 : i32
    %c0_i32_0 = arith.constant 0 : i32
    %c0_i32_1 = arith.constant 0 : i32
    return %c0_i32, %c0_i32_0 : i32, i32
  }
  func.func @transform_2(%arg0: i32) -> (i32, i32) {
    %c0_i32 = arith.constant 0 : i32
    %c0_i32_0 = arith.constant 0 : i32
    %c0_i32_1 = arith.constant 0 : i32
    return %c0_i32, %c0_i32_0 : i32, i32
  }
  func.func @transform_3(%arg0: i32) -> (i32, i32) {
    %c0_i32 = arith.constant 0 : i32
    %c0_i32_0 = arith.constant 0 : i32
    %c0_i32_1 = arith.constant 0 : i32
    return %c0_i32, %c0_i32_0 : i32, i32
  }
  func.func @transform_4(%arg0: i32) -> (i32, i32) {
    %c0_i32 = arith.constant 0 : i32
    %c0_i32_0 = arith.constant 0 : i32
    %c0_i32_1 = arith.constant 0 : i32
    return %c0_i32, %c0_i32_0 : i32, i32
  }
  func.func @transform_5(%arg0: i32) -> (i32, i32) {
    %c0_i32 = arith.constant 0 : i32
    %c0_i32_0 = arith.constant 0 : i32
    return %arg0, %c0_i32 : i32, i32
  }
}

</mosaic_0001>

<bundles_post_ra>
// kernel: _lambda_.1
= control target key start
LH: loop header
LB: loop body
LE: loop exit
PB: predicated region body
PF: predicated region fallthrough
CT: control target
= control target key end

     0   :  { %s1271_s0 = inlined_call_operand.vmem [shape: f32[8,784], index: 0, kind: input, shape index: {}]   ;;  %s1272_s1 = inlined_call_operand.vmem [shape: f32[784,128], index: 1, kind: input, shape index: {}]   ;;  %s1273_s2 = inlined_call_operand.vmem [shape: f32[1,128], index: 2, kind: input, shape index: {}]   ;;  %s1274_s3 = inlined_call_operand.vmem [shape: f32[128,128], index: 3, kind: input, shape index: {}]   ;;  %s1275_s4 = inlined_call_operand.vmem [shape: f32[1,128], index: 4, kind: input, shape index: {}]   ;;  %s1276_s5 = inlined_call_operand.hbm [shape: f32[8,128], index: 5, kind: output, shape index: {}]  }
   0x1   :  { %v44_v0 = vld [vmem:[%s1272_s1 + $0x80] sm:$0xff]  ;;  %v45_v1 = vld [vmem:[%s1272_s1 + $0x88] sm:$0xff]  ;;  %v46_v11 = vld [vmem:[%s1272_s1 + $0x90] sm:$0xff] }
   0x2   :  { %v28_v2 = vld [vmem:[%s1272_s1] sm:$0xff]  ;;  %v696_v3 = vpack.c.bf16 %v45_v1, %v44_v0  ;;  %v29_v4 = vld [vmem:[%s1272_s1 + $0x8] sm:$0xff]  ;;  %v47_v13 = vld [vmem:[%s1272_s1 + $0x98] sm:$0xff] }
   0x3   :  { %v76_v5 = vld [vmem:[%s1272_s1 + $0x180] sm:$0xff]  ;;  %v77_v6 = vld [vmem:[%s1272_s1 + $0x188] sm:$0xff]  ;;  %v698_v7 = vpack.c.bf16 %v29_v4, %v28_v2  ;;  %v30_v14 = vld [vmem:[%s1272_s1 + $0x10] sm:$0xff]  ;;  %v700_v16 = vpack.c.bf16 %v47_v13, %v46_v11 }
   0x4   :  { %v728_v8 = vpack.c.bf16 %v77_v6, %v76_v5  ;;  %v60_v9 = vld [vmem:[%s1272_s1 + $0x100] sm:$0xff]  ;;  %v61_v10 = vld [vmem:[%s1272_s1 + $0x108] sm:$0xff]  ;;  %697 = vmatprep.subr.bf16.mxu0 %v696_v3  ;;  %v31_v15 = vld [vmem:[%s1272_s1 + $0x18] sm:$0xff] }
   0x5   :  { %v730_v12 = vpack.c.bf16 %v61_v10, %v60_v9  ;;  %699 = vmatpush3.bf16.msra.mxu0 %v698_v7  ;;  %v702_v17 = vpack.c.bf16 %v31_v15, %v30_v14  ;;  %v78_v18 = vld [vmem:[%s1272_s1 + $0x190] sm:$0xff]  ;;  %v79_v19 = vld [vmem:[%s1272_s1 + $0x198] sm:$0xff]  ;;  %v48_v23 = vld [vmem:[%s1272_s1 + $0xa0] sm:$0xff] }
   0x6   :  { %729 = vmatprep.subr.bf16.mxu1 %v728_v8  ;;  %v62_v20 = vld [vmem:[%s1272_s1 + $0x110] sm:$0xff]  ;;  %v732_v21 = vpack.c.bf16 %v79_v19, %v78_v18  ;;  %v63_v22 = vld [vmem:[%s1272_s1 + $0x118] sm:$0xff]  ;;  %v49_v24 = vld [vmem:[%s1272_s1 + $0xa8] sm:$0xff]  ;;  %701 = vmatprep.subr.bf16.mxu0 %v700_v16 }
   0x7   :  { %731 = vmatpush3.bf16.msra.mxu1 %v730_v12  ;;  %v734_v25 = vpack.c.bf16 %v63_v22, %v62_v20  ;;  %v704_v26 = vpack.c.bf16 %v49_v24, %v48_v23  ;;  %v32_v27 = vld [vmem:[%s1272_s1 + $0x20] sm:$0xff]  ;;  %v33_v28 = vld [vmem:[%s1272_s1 + $0x28] sm:$0xff]  ;;  %v50_v35 = vld [vmem:[%s1272_s1 + $0xb0] sm:$0xff] }
   0x8   :  { %v80_v29 = vld [vmem:[%s1272_s1 + $0x1a0] sm:$0xff]  ;;  %733 = vmatprep.subr.bf16.mxu1 %v732_v21  ;;  %v81_v30 = vld [vmem:[%s1272_s1 + $0x1a8] sm:$0xff]  ;;  %v706_v33 = vpack.c.bf16 %v33_v28, %v32_v27  ;;  %v51_v36 = vld [vmem:[%s1272_s1 + $0xb8] sm:$0xff] }
   0x9   :  { %v64_v31 = vld [vmem:[%s1272_s1 + $0x120] sm:$0xff]  ;;  %v65_v32 = vld [vmem:[%s1272_s1 + $0x128] sm:$0xff]  ;;  %703 = vmatpush3.bf16.msra.mxu0 %v702_v17  ;;  %v736_v34 = vpack.c.bf16 %v81_v30, %v80_v29  ;;  %v34_v37 = vld [vmem:[%s1272_s1 + $0x30] sm:$0xff]  ;;  %v708_v39 = vpack.c.bf16 %v51_v36, %v50_v35 }
   0xa   :  { %705 = vmatprep.subr.bf16.mxu0 %v704_v26  ;;  %v738_v38 = vpack.c.bf16 %v65_v32, %v64_v31  ;;  %v35_v40 = vld [vmem:[%s1272_s1 + $0x38] sm:$0xff]  ;;  %v82_v41 = vld [vmem:[%s1272_s1 + $0x1b0] sm:$0xff]  ;;  %v52_v46 = vld [vmem:[%s1272_s1 + $0xc0] sm:$0xff] }
   0xb   :  { %735 = vmatpush3.bf16.msra.mxu1 %v734_v25  ;;  %v83_v42 = vld [vmem:[%s1272_s1 + $0x1b8] sm:$0xff]  ;;  %v66_v44 = vld [vmem:[%s1272_s1 + $0x130] sm:$0xff]  ;;  %v53_v47 = vld [vmem:[%s1272_s1 + $0xc8] sm:$0xff]  ;;  %v710_v48 = vpack.c.bf16 %v35_v40, %v34_v37 }
   0xc   :  { %737 = vmatprep.subr.bf16.mxu1 %v736_v34  ;;  %v740_v43 = vpack.c.bf16 %v83_v42, %v82_v41  ;;  %v67_v45 = vld [vmem:[%s1272_s1 + $0x138] sm:$0xff]  ;;  %v84_v49 = vld [vmem:[%s1272_s1 + $0x1c0] sm:$0xff]  ;;  %v85_v50 = vld [vmem:[%s1272_s1 + $0x1c8] sm:$0xff]  ;;  %v712_v52 = vpack.c.bf16 %v53_v47, %v52_v46 }
   0xd   :  { %707 = vmatpush3.bf16.msra.mxu0 %v706_v33  ;;  %v742_v51 = vpack.c.bf16 %v67_v45, %v66_v44  ;;  %v36_v53 = vld [vmem:[%s1272_s1 + $0x40] sm:$0xff]  ;;  %v37_v54 = vld [vmem:[%s1272_s1 + $0x48] sm:$0xff]  ;;  %v744_v56 = vpack.c.bf16 %v85_v50, %v84_v49  ;;  %v54_v58 = vld [vmem:[%s1272_s1 + $0xd0] sm:$0xff]  ;;  %v847_v50 = vmov 0.0|0.0  }
   0xe   :  { %709 = vmatprep.subr.bf16.mxu0 %v708_v39  ;;  %v68_v55 = vld [vmem:[%s1272_s1 + $0x140] sm:$0xff]  ;;  %v69_v57 = vld [vmem:[%s1272_s1 + $0x148] sm:$0xff]  ;;  %v55_v59 = vld [vmem:[%s1272_s1 + $0xd8] sm:$0xff]  ;;  %v714_v62 = vpack.c.bf16 %v37_v54, %v36_v53 }
   0xf   :  { %739 = vmatpush3.bf16.msra.mxu1 %v738_v38  ;;  %v86_v60 = vld [vmem:[%s1272_s1 + $0x1d0] sm:$0xff]  ;;  %v87_v61 = vld [vmem:[%s1272_s1 + $0x1d8] sm:$0xff]  ;;  %v746_v63 = vpack.c.bf16 %v69_v57, %v68_v55  ;;  %v716_v0 = vpack.c.bf16 %v55_v59, %v54_v58  ;;  %v56_v6 = vld [vmem:[%s1272_s1 + $0xe0] sm:$0xff] }
  0x10   :  { %741 = vmatprep.subr.bf16.mxu1 %v740_v43  ;;  %v38_v1 = vld [vmem:[%s1272_s1 + $0x50] sm:$0xff]  ;;  %v39_v2 = vld [vmem:[%s1272_s1 + $0x58] sm:$0xff]  ;;  %v748_v4 = vpack.c.bf16 %v87_v61, %v86_v60  ;;  %v57_v7 = vld [vmem:[%s1272_s1 + $0xe8] sm:$0xff] }
  0x11   :  { %711 = vmatpush3.bf16.msra.mxu0 %v710_v48  ;;  %v70_v3 = vld [vmem:[%s1272_s1 + $0x150] sm:$0xff]  ;;  %v71_v5 = vld [vmem:[%s1272_s1 + $0x158] sm:$0xff]  ;;  %v88_v8 = vld [vmem:[%s1272_s1 + $0x1e0] sm:$0xff]  ;;  %v718_v10 = vpack.c.bf16 %v39_v2, %v38_v1  ;;  %v720_v14 = vpack.c.bf16 %v57_v7, %v56_v6 }
  0x12   :  { %713 = vmatprep.subr.bf16.mxu0 %v712_v52  ;;  %v89_v9 = vld [vmem:[%s1272_s1 + $0x1e8] sm:$0xff]  ;;  %v40_v11 = vld [vmem:[%s1272_s1 + $0x60] sm:$0xff]  ;;  %v750_v13 = vpack.c.bf16 %v71_v5, %v70_v3  ;;  %v58_v19 = vld [vmem:[%s1272_s1 + $0xf0] sm:$0xff] }
  0x13   :  { %743 = vmatpush3.bf16.msra.mxu1 %v742_v51  ;;  %v22_v12 = vld [vmem:[%s1271_s0 + $0x8] sm:$0xff]  ;;  %v72_v16 = vld [vmem:[%s1272_s1 + $0x160] sm:$0xff]  ;;  %v752_v18 = vpack.c.bf16 %v89_v9, %v88_v8  ;;  %v59_v20 = vld [vmem:[%s1272_s1 + $0xf8] sm:$0xff] }
  0x14   :  { %745 = vmatprep.subr.bf16.mxu1 %v744_v56  ;;  %v41_v15 = vld [vmem:[%s1272_s1 + $0x68] sm:$0xff]  ;;  %201 = vmatprep.mubr.f32.mxu0 %v22_v12  ;;  %v24_v21 = vld [vmem:[%s1271_s0 + $0x18] sm:$0xff]  ;;  %v90_v22 = vld [vmem:[%s1272_s1 + $0x1f0] sm:$0xff]  ;;  %v724_v26 = vpack.c.bf16 %v59_v20, %v58_v19 }
  0x15   :  { %715 = vmatpush3.bf16.msra.mxu0 %v714_v62  ;;  %v73_v17 = vld [vmem:[%s1272_s1 + $0x168] sm:$0xff]  ;;  %v91_v23 = vld [vmem:[%s1272_s1 + $0x1f8] sm:$0xff]  ;;  %271 = vmatprep.mubr.f32.mxu1 %v24_v21  ;;  %v722_v24 = vpack.c.bf16 %v41_v15, %v40_v11  ;;  %v42_v27 = vld [vmem:[%s1272_s1 + $0x70] sm:$0xff] }
  0x16   :  { %717 = vmatprep.subr.bf16.mxu0 %v716_v0  ;;  %v754_v25 = vpack.c.bf16 %v73_v17, %v72_v16  ;;  %v43_v28 = vld [vmem:[%s1272_s1 + $0x78] sm:$0xff]  ;;  %v74_v29 = vld [vmem:[%s1272_s1 + $0x170] sm:$0xff]  ;;  %v756_v30 = vpack.c.bf16 %v91_v23, %v90_v22  ;;  %v108_v32 = vld [vmem:[%s1272_s1 + $0x280] sm:$0xff] }
  0x17   :  { %747 = vmatpush3.bf16.msra.mxu1 %v746_v63  ;;  %v75_v31 = vld [vmem:[%s1272_s1 + $0x178] sm:$0xff]  ;;  %v109_v33 = vld [vmem:[%s1272_s1 + $0x288] sm:$0xff]  ;;  %v726_v34 = vpack.c.bf16 %v43_v28, %v42_v27  ;;  %v92_v37 = vld [vmem:[%s1272_s1 + $0x200] sm:$0xff] }
  0x18   :  { %749 = vmatprep.subr.bf16.mxu1 %v748_v4  ;;  %v758_v35 = vpack.c.bf16 %v75_v31, %v74_v29  ;;  %v760_v36 = vpack.c.bf16 %v109_v33, %v108_v32  ;;  %v93_v38 = vld [vmem:[%s1272_s1 + $0x208] sm:$0xff]  ;;  %v110_v39 = vld [vmem:[%s1272_s1 + $0x290] sm:$0xff]  ;;  %v111_v40 = vld [vmem:[%s1272_s1 + $0x298] sm:$0xff] }
  0x19   :  { %719 = vmatpush3.bf16.msra.mxu0 %v718_v10  ;;  %v21_v41 = vld [vmem:[%s1271_s0] sm:$0xff]  ;;  %v762_v42 = vpack.c.bf16 %v93_v38, %v92_v37  ;;  %v23_v43 = vld [vmem:[%s1271_s0 + $0x10] sm:$0xff]  ;;  %v764_v45 = vpack.c.bf16 %v111_v40, %v110_v39  ;;  %v95_v46 = vld [vmem:[%s1272_s1 + $0x218] sm:$0xff] }
  0x1a   :  { %721 = vmatprep.subr.bf16.mxu0 %v720_v14  ;;  %v94_v44 = vld [vmem:[%s1272_s1 + $0x210] sm:$0xff]  ;;  %v112_v47 = vld [vmem:[%s1272_s1 + $0x2a0] sm:$0xff]  ;;  %v113_v48 = vld [vmem:[%s1272_s1 + $0x2a8] sm:$0xff] }
  0x1b   :  { %751 = vmatpush3.bf16.msra.mxu1 %v750_v13  ;;  %v26_v49 = vld [vmem:[%s1271_s0 + $0x28] sm:$0xff]  ;;  %v124_v51 = vld [vmem:[%s1272_s1 + $0x300] sm:$0xff] }
  0x1c   :  { %753 = vmatprep.subr.bf16.mxu1 %v752_v18  ;;  %v125_v52 = vld [vmem:[%s1272_s1 + $0x308] sm:$0xff] }
  0x1d   :  { %723 = vmatpush3.bf16.msra.mxu0 %v722_v24  ;;  %v793_v53 = vpack.c.bf16 %v125_v52, %v124_v51 }
  0x1e   :  { %725 = vmatprep.subr.bf16.mxu0 %v724_v26 }
  0x1f   :  { %755 = vmatpush3.bf16.msra.mxu1 %v754_v25 }
  0x20   :  { %757 = vmatprep.subr.bf16.mxu1 %v756_v30 }
  0x21   :  { %727 = vmatpush3.bf16.msra.mxu0 %v726_v34 }
  0x22   :  { %761 = vmatprep.subr.bf16.mxu0 %v760_v36 }
  0x23   :  { %759 = vmatpush3.bf16.msra.mxu1 %v758_v35 }
  0x24   :  { %792 = vmatprep.subr.bf16.mxu1 %v847_v50  ;;  %202 = vmatmul.mubr.f32.vlgmr.msra.gmra.mrb[0].mxu0 %v21_v41 }
  0x25   :  { %10 = vsyncpa [#allocation3], 0  ;;  %763 = vmatpush3.bf16.msra.mxu0 %v762_v42  ;;  %v766_v54 = vpack.c.bf16 %v95_v46, %v94_v44  ;;  %v768_v55 = vpack.c.bf16 %v113_v48, %v112_v47  ;;  %v96_v56 = vld [vmem:[%s1272_s1 + $0x220] sm:$0xff]  ;;  %v97_v57 = vld [vmem:[%s1272_s1 + $0x228] sm:$0xff]  ;;  %341 = vmatprep.mubr.f32.mxu0 %v26_v49  ;;  %vm848_vm0 = vmmov 0   ;;  %v849_v60 = vmov 0.0  }
  0x26   :  { %272 = vmatmul.mubr.f32.vlgmr.msra.gmra.mrb[0].mxu1 %v23_v43  ;;  %765 = vmatprep.subr.bf16.mxu0 %v764_v45  ;;  %v114_v58 = vld [vmem:[%s1272_s1 + $0x2b0] sm:$0xff]  ;;  %v115_v59 = vld [vmem:[%s1272_s1 + $0x2b8] sm:$0xff]  ;;  %vm133_vm1 = vcmask 130048   ;;  %v770_v62 = vpack.c.bf16 %v97_v57, %v96_v56  ;;  %v116_v2 = vld [vmem:[%s1272_s1 + $0x2c0] sm:$0xff] }
  0x27   :  { %794 = vmatpush3.bf16.msra.mxu1 %v793_v53  ;;  %658 = vmatprep.mubr.msk.f32.mxu1 %vm848_vm0, %v849_v60  ;;  %v27_v61 = vld [vmem:[%s1271_s0 + $0x30] sm:$0xff]  ;;  %v772_v63 = vpack.c.bf16 %v115_v59, %v114_v58  ;;  %v99_v1 = vld [vmem:[%s1272_s1 + $0x238] sm:$0xff]  ;;  %v117_v3 = vld [vmem:[%s1272_s1 + $0x2c8] sm:$0xff] }
  0x28   :  { %795 = vmatprep.subr.bf16.mxu1 %v847_v50  ;;  %v98_v0 = vld [vmem:[%s1272_s1 + $0x230] sm:$0xff]  ;;  %v776_v5 = vpack.c.bf16 %v117_v3, %v116_v2  ;;  %v100_v6 = vld [vmem:[%s1272_s1 + $0x240] sm:$0xff]  ;;  %v101_v7 = vld [vmem:[%s1272_s1 + $0x248] sm:$0xff] }
  0x29   :  { %767 = vmatpush3.bf16.msra.mxu0 %v766_v54  ;;  %v774_v4 = vpack.c.bf16 %v99_v1, %v98_v0  ;;  %v118_v8 = vld [vmem:[%s1272_s1 + $0x2d0] sm:$0xff]  ;;  %v119_v9 = vld [vmem:[%s1272_s1 + $0x2d8] sm:$0xff]  ;;  %v778_v10 = vpack.c.bf16 %v101_v7, %v100_v6  ;;  %v120_v14 = vld [vmem:[%s1272_s1 + $0x2e0] sm:$0xff] }
  0x2a   :  { %769 = vmatprep.subr.bf16.mxu0 %v768_v55  ;;  %659 = vmatmul.mubr.msk.f32.vlgmr.msra.gmra.mrb[2].mxu1 %vm133_vm1, %v27_v61  ;;  %v780_v11 = vpack.c.bf16 %v119_v9, %v118_v8  ;;  %v102_v12 = vld [vmem:[%s1272_s1 + $0x250] sm:$0xff]  ;;  %v103_v13 = vld [vmem:[%s1272_s1 + $0x258] sm:$0xff]  ;;  %v121_v15 = vld [vmem:[%s1272_s1 + $0x2e8] sm:$0xff] }
  0x2b   :  { %693 = vmatprep.mubr.msk.f32.mxu1 %vm848_vm0, %v849_v60  ;;  %v782_v16 = vpack.c.bf16 %v103_v13, %v102_v12  ;;  %v784_v17 = vpack.c.bf16 %v121_v15, %v120_v14  ;;  %v104_v18 = vld [vmem:[%s1272_s1 + $0x260] sm:$0xff]  ;;  %v105_v19 = vld [vmem:[%s1272_s1 + $0x268] sm:$0xff]  ;;  %v122_v20 = vld [vmem:[%s1272_s1 + $0x2f0] sm:$0xff] }
  0x2c   :  { %v123_v21 = vld [vmem:[%s1272_s1 + $0x2f8] sm:$0xff]  ;;  %v786_v22 = vpack.c.bf16 %v105_v19, %v104_v18  ;;  %v106_v24 = vld [vmem:[%s1272_s1 + $0x270] sm:$0xff]  ;;  %v25_v27 = vld [vmem:[%s1271_s0 + $0x20] sm:$0xff] }
  0x2d   :  { %771 = vmatpush3.bf16.msra.mxu0 %v770_v62  ;;  %v788_v23 = vpack.c.bf16 %v123_v21, %v122_v20  ;;  %v107_v25 = vld [vmem:[%s1272_s1 + $0x278] sm:$0xff]  ;;  %v418_v28 = vld [vmem:[%s1274_s3] sm:$0xff]  ;;  %v419_v29 = vld [vmem:[%s1274_s3 + $0x8] sm:$0xff] }
  0x2e   :  { %773 = vmatprep.subr.bf16.mxu0 %v772_v63  ;;  %v790_v26 = vpack.c.bf16 %v107_v25, %v106_v24  ;;  %v420_v30 = vld [vmem:[%s1274_s3 + $0x10] sm:$0xff]  ;;  %v796_v31 = vpack.c.bf16 %v419_v29, %v418_v28  ;;  %v421_v32 = vld [vmem:[%s1274_s3 + $0x18] sm:$0xff]  ;;  %v422_v34 = vld [vmem:[%s1274_s3 + $0x20] sm:$0xff] }
  0x2f   :  { %v799_v33 = vpack.c.bf16 %v421_v32, %v420_v30  ;;  %v423_v35 = vld [vmem:[%s1274_s3 + $0x28] sm:$0xff]  ;;  %v424_v37 = vld [vmem:[%s1274_s3 + $0x30] sm:$0xff]  ;;  %v425_v38 = vld [vmem:[%s1274_s3 + $0x38] sm:$0xff] }
  0x30   :  { %797 = vmatpush3.bf16.msra.mxu1 %v796_v31  ;;  %v802_v36 = vpack.c.bf16 %v423_v35, %v422_v34  ;;  %v805_v39 = vpack.c.bf16 %v425_v38, %v424_v37  ;;  %v426_v40 = vld [vmem:[%s1274_s3 + $0x40] sm:$0xff]  ;;  %v427_v41 = vld [vmem:[%s1274_s3 + $0x48] sm:$0xff]  ;;  %v428_v43 = vld [vmem:[%s1274_s3 + $0x50] sm:$0xff] }
  0x31   :  { %775 = vmatpush3.bf16.msra.mxu0 %v774_v4  ;;  %798 = vmatprep.subr.bf16.mxu1 %v847_v50  ;;  %v808_v42 = vpack.c.bf16 %v427_v41, %v426_v40  ;;  %v429_v44 = vld [vmem:[%s1274_s3 + $0x58] sm:$0xff]  ;;  %v430_v46 = vld [vmem:[%s1274_s3 + $0x60] sm:$0xff]  ;;  %v431_v47 = vld [vmem:[%s1274_s3 + $0x68] sm:$0xff] }
  0x32   :  { %777 = vmatprep.subr.bf16.mxu0 %v776_v5  ;;  %v811_v45 = vpack.c.bf16 %v429_v44, %v428_v43  ;;  %v814_v48 = vpack.c.bf16 %v431_v47, %v430_v46  ;;  %v432_v49 = vld [vmem:[%s1274_s3 + $0x70] sm:$0xff]  ;;  %v433_v51 = vld [vmem:[%s1274_s3 + $0x78] sm:$0xff]  ;;  %v526_v54 = vld [vmem:[%s1273_s2] ss:$0 sm:$0xff]  ;;  %s850_s2 = smov [#allocation2]  }
  0x33   :  { %v817_v52 = vpack.c.bf16 %v433_v51, %v432_v49  ;;  %v528_v5 = vld [vmem:[%s1275_s4] ss:$0 sm:$0xff]  ;;  %s518_s0 = sshll.u32 %s850_s2, 4  ;;  %s519_s0 = int_to_ptr.vmem [resolvable:$true] %s518_s0 }
  0x34   :  { %800 = vmatpush3.bf16.msra.mxu1 %v799_v33  ;;  %s823_s10 = scalar_lea.vmem %s519_s0, 128  ;;  %p828_p1 = scmp.lt.s32.totalorder %s519_s0, %s519_s0 }
  0x35   :  { %779 = vmatpush3.bf16.msra.mxu0 %v778_v10  ;;  %801 = vmatprep.subr.bf16.mxu1 %v847_v50  ;;  %p824_p0 = scmp.ne.s32.totalorder %s519_s0, %s823_s10  ;;  %p829_p2 = scmp.lt.s32.totalorder %s823_s10, %s823_s10 }
  0x36   :  { %781 = vmatprep.subr.bf16.mxu0 %v780_v11 }
  0x37   :  { %p830_p3 = por %p829_p2, %p828_p1 }
  0x38   :  { %803 = vmatpush3.bf16.msra.mxu1 %v802_v36 }
  0x39   :  { %783 = vmatpush3.bf16.msra.mxu0 %v782_v16  ;;  %804 = vmatprep.subr.bf16.mxu1 %v847_v50  ;;  %p831_p4 = pnand %p830_p3, %p824_p0 }
  0x3a   :  { %785 = vmatprep.subr.bf16.mxu0 %v784_v17 }
  0x3c   :  { %806 = vmatpush3.bf16.msra.mxu1 %v805_v39 }
  0x3d   :  { %787 = vmatpush3.bf16.msra.mxu0 %v786_v22  ;;  %807 = vmatprep.subr.bf16.mxu1 %v847_v50 }
  0x3e   :  { %789 = vmatprep.subr.bf16.mxu0 %v788_v23 }
  0x40   :  { %809 = vmatpush3.bf16.msra.mxu1 %v808_v42 }
  0x41   :  { %791 = vmatpush3.bf16.msra.mxu0 %v790_v26  ;;  %810 = vmatprep.subr.bf16.mxu1 %v847_v50 }
  0x44   :  { %342 = vmatmul.mubr.f32.vlgmr.msra.gmra.mrb[2].mxu0 %v25_v27  ;;  %812 = vmatpush3.bf16.msra.mxu1 %v811_v45 }
  0x45   :  { %813 = vmatprep.subr.bf16.mxu1 %v847_v50 }
  0x48   :  { %815 = vmatpush3.bf16.msra.mxu1 %v814_v48 }
  0x49   :  { %816 = vmatprep.subr.bf16.mxu1 %v847_v50 }
  0x4c   :  { %818 = vmatpush3.bf16.msra.mxu1 %v817_v52 }
  0xf7   :  { %v561_v53 = vpop.f32.mrb[0].mxu0 }
  0xf8   :  { %v562_v55 = vpop.f32.mrb[1].mxu0 }
  0xf9   :  { %v596_v56 = vpop.f32.mrb[0].mxu1  ;;  %v563_v57 = vadd.f32 %v562_v55, %v561_v53 }
  0xfa   :  { %v597_v58 = vpop.f32.mrb[1].mxu1 }
  0xfb   :  { %v598_v50 = vadd.f32 %v597_v58, %v596_v56  ;;  %v204_v59 = vadd.f32 %v563_v57, %v526_v54 }
  0xfd   :  { %v274_v60 = vadd.f32 %v598_v50, %v204_v59  ;;  %v413_v61 = vpop.f32.mrb[2].mxu1 }
  0xfe   :  { %v660_v62 = vpop.f32.mrb[3].mxu1 }
 0x117   :  { %v631_v63 = vpop.f32.mrb[2].mxu0 }
 0x118   :  { %v632_v0 = vpop.f32.mrb[3].mxu0 }
 0x119   :  { %v633_v1 = vadd.f32 %v632_v0, %v631_v63 }
 0x11b   :  { %v344_v2 = vadd.f32 %v633_v1, %v274_v60 }
 0x11d   :  { %v414_v3 = vadd.f32 %v413_v61, %v344_v2 }
 0x11f   :  { %v417_v4 = vmax.f32 %v414_v3, 0.0 }
 0x121   :  { %694 = vmatmul.mubr.f32.vlgmr.msra.gmra.mrb[4].mxu1 %v417_v4 }
 0x1f4   :  { %v507_v6 = vpop.f32.mrb[4].mxu1 }
 0x1f5   :  { %v508_v7 = vadd.f32 %v528_v5, %v507_v6  ;;  %v695_v8 = vpop.f32.mrb[5].mxu1 }
 0x1f7   :  { %511 = vst [vmem:[#allocation2] sm:$0xff] %v508_v7 }
 0x1f8   :  { %834 = shalt.err (!%p831_p4)
}
 0x1f9   :  { %s835_s13 = scalar_lea.hbm %s1276_s5, 128 }
 0x1fa   :  { %p836_p5 = scmp.ne.s32.totalorder %s1276_s5, %s835_s13  ;;  %p839_p6 = scmp.lt.u32.totalorder %s835_s13, %s1276_s5 }
 0x1fc   :  { %p841_p7 = pnand %p839_p6, %p836_p5 }
 0x1fe   :  { %844 = shalt.err (!%p841_p7)
}
 0x1ff   :  { %521 = dma.vmem_to_hbm [thread:$0]  %s519_s0, 128, %s1276_s5, [#allocation3]  }
 0x200   :  { %845 = dma.done.wait [#allocation3], 128  }
 0x201   :  { %846 = vsyncadd [#allocation3], 4294967168 }
 0x202   :  { %525 = vsyncpa [#allocation3], 1 }

</bundles_post_ra>
